<compile_context>
chip_gen: v7x
topology: tpu7x:2x2x1
jax: 0.10.0
libtpu: 0.0.40
codegen_flags: <defaults>
</compile_context>

<pallas_src>
import functools

import jax
import jax.numpy as jnp
from jax.experimental import pallas as pl
from jax.experimental.pallas import tpu as pltpu


def _round_up(x, m):
    return (x + m - 1) // m * m


def _pick_block_batch(B, L, V, Ep):
    # Rough per-sentence VMEM footprint per grid step (double-buffered I/O plus
    # the one-hot / gathered-embedding intermediates), in bytes.
    per_sentence = 4 * L * (V + 2 * Ep + 8) + 4 * (Ep + 2 * L + 8)
    budget = 8 * 1024 * 1024  # headroom below the 32 MiB scoped VMEM limit (v7x-safe)
    cap = max(int(budget // per_sentence), 1)
    if B <= cap:
        return B                       # single grid step: block == full batch dim
    return max(8, min((cap // 8) * 8, 1024))   # multiple of 8 for sublane alignment


def _summarizer_kernel(ids_ref, invlen_ref, w_ref, an_t_ref, aw_ref,
                       out_ref, attn_ref, cs_ref, *, word_thres):
    # ids_ref   : (TB, L, 1) int32   token ids (words on sublanes)
    # invlen_ref: (TB, 1)    f32     1 / (sentence_len + 1e-5)
    # w_ref     : (V, Ep)    f32     embedding table (E zero-padded to Ep)
    # an_t_ref  : (Ep, A)    f32     aspect embeddings, pre-normalized, transposed
    # aw_ref    : (1, A)     f32     aspect weights
    TB, L, _ = ids_ref.shape
    V, Ep = w_ref.shape

    ids3 = ids_ref[...]                                        # (TB, L, 1)

    # ---- fused embedding gather: one-hot @ table on the MXU (exact) ----
    iota_v = jax.lax.broadcasted_iota(jnp.int32, (TB, L, V), 2)
    onehot = (iota_v == ids3).astype(jnp.float32)              # (TB, L, V)
    x_flat = jnp.dot(onehot.reshape(TB * L, V), w_ref[...],
                     preferred_element_type=jnp.float32)       # (TB*L, Ep)
    x3 = x_flat.reshape(TB, L, Ep)                             # (TB, L, Ep)

    # ---- cosine similarity vs pre-normalized aspects (long dim on MXU M axis) ----
    dots = jnp.dot(x_flat, an_t_ref[...],
                   preferred_element_type=jnp.float32)         # (TB*L, A)
    sim3 = dots.reshape(TB, L, A := an_t_ref.shape[1])         # (TB, L, A)
    x_sumsq = jnp.sum(x3 * x3, axis=2, keepdims=True)          # (TB, L, 1)
    inv_xn = jax.lax.rsqrt(jnp.maximum(x_sumsq, 1e-16))        # == 1/max(||x||, 1e-8)
    cos = sim3 * inv_xn                                        # (TB, L, A)

    # threshold on the UNWEIGHTED cosine (word_sim_thres), then aspect weights
    passed = cos > word_thres
    aw = aw_ref[...][None]                                     # (1, 1, A)
    simw = jnp.where(passed, cos, 0.0) * aw                    # (TB, L, A)

    # ---- centroid score ----
    cs_word = jnp.max(jnp.maximum(simw, 0.0), axis=2, keepdims=True)   # (TB, L, 1)
    centroid = jnp.sum(cs_word, axis=1) * invlen_ref[...]      # (TB, 1)

    # ---- attention: predicate-based mask, max over aspects, softmax over words ----
    live = passed & (aw != 0.0)
    sim_m = jnp.where(live, simw, -1e9)                        # (TB, L, A)
    s = jnp.max(sim_m, axis=2, keepdims=True)                  # (TB, L, 1)
    m = jnp.max(s, axis=1, keepdims=True)                      # (TB, 1, 1)
    e = jnp.exp(s - m)                                         # (TB, L, 1)
    denom = jnp.sum(e, axis=1, keepdims=True)                  # (TB, 1, 1)
    att3 = e * pl.reciprocal(denom, approx=True)               # (TB, L, 1)

    # ---- attention-weighted pooling: VPU multiply + sublane reduce ----
    z = jnp.sum(att3 * x3, axis=1)                             # (TB, Ep)
    gate = jnp.where(centroid > 1e-4, 1.0, 0.0)                # (TB, 1)

    out_ref[...] = (z * gate).astype(out_ref.dtype)            # (TB, Ep)
    attn_ref[...] = att3[:, :, 0].astype(attn_ref.dtype)       # (TB, L)
    cs_ref[...] = centroid.astype(cs_ref.dtype)                # (TB, 1)


def aspect_memory_summarizer(inputs, w_emb, a_emb, a_weight, word_thres=0.2):
    """inputs: (B, L) int32 token ids; returns (enc_out, enc_attention, centroid_score)."""
    B, L = inputs.shape
    V, E = w_emb.shape
    A = a_emb.shape[0]
    Ep = _round_up(E, 128)                 # lane-dense enc_out stores

    # batch-invariant prep (done once, outside the kernel)
    a32 = a_emb.astype(jnp.float32)
    a_norm = jnp.maximum(jnp.sqrt(jnp.sum(a32 * a32, axis=1, keepdims=True)), 1e-8)
    an_t = jnp.pad((a32 / a_norm).T, ((0, Ep - E), (0, 0)))            # (Ep, A)
    w32 = jnp.pad(w_emb.astype(jnp.float32), ((0, 0), (0, Ep - E)))    # (V, Ep)
    aw = jnp.asarray(a_weight, jnp.float32).reshape(1, A)              # (1, A)

    # per-sentence reciprocal lengths
    inv_len = 1.0 / (jnp.sum((inputs != 0).astype(jnp.float32),
                             axis=1, keepdims=True) + 1e-5)            # (B, 1)

    TB = _pick_block_batch(B, L, V, Ep)
    Bp = _round_up(B, TB)
    ids = inputs.astype(jnp.int32)
    if Bp != B:
        ids = jnp.pad(ids, ((0, Bp - B), (0, 0)))
        inv_len = jnp.pad(inv_len, ((0, Bp - B), (0, 0)), constant_values=1.0)
    ids3 = ids[:, :, None]                                             # (Bp, L, 1)

    kernel = functools.partial(_summarizer_kernel, word_thres=word_thres)

    grid_spec = pltpu.PrefetchScalarGridSpec(
        num_scalar_prefetch=0,
        grid=(Bp // TB,),
        in_specs=[
            pl.BlockSpec((TB, L, 1), lambda i: (i, 0, 0)),   # token ids
            pl.BlockSpec((TB, 1), lambda i: (i, 0)),         # 1/(len+1e-5)
            pl.BlockSpec((V, Ep), lambda i: (0, 0)),         # embedding table (resident)
            pl.BlockSpec((Ep, A), lambda i: (0, 0)),         # normalized aspects^T
            pl.BlockSpec((1, A), lambda i: (0, 0)),          # aspect weights
        ],
        out_specs=[
            pl.BlockSpec((TB, Ep), lambda i: (i, 0)),        # enc_out (padded E)
            pl.BlockSpec((TB, L), lambda i: (i, 0)),         # enc_attention
            pl.BlockSpec((TB, 1), lambda i: (i, 0)),         # centroid_score
        ],
    )

    enc_out, attn, cs = pl.pallas_call(
        kernel,
        out_shape=(
            jax.ShapeDtypeStruct((Bp, Ep), jnp.float32),
            jax.ShapeDtypeStruct((Bp, L), jnp.float32),
            jax.ShapeDtypeStruct((Bp, 1), jnp.float32),
        ),
        grid_spec=grid_spec,
        compiler_params=pltpu.CompilerParams(
            dimension_semantics=("parallel",),
            vmem_limit_bytes=32 * 1024 * 1024,
        ),
    )(ids3, inv_len, w32, an_t, aw)

    return enc_out[:B, :E], attn[:B], cs[:B, 0]


def _reference(inputs, w_emb, a_emb, a_weight, word_thres=0.2):
    # pure-JAX mirror of the PyTorch forward for a correctness check
    inputs_len = jnp.sum((inputs != 0).astype(jnp.float32), axis=1)    # (B,)
    x_wrd = jnp.take(w_emb, inputs, axis=0)                            # (B, L, E)
    a = a_emb[:, None, None, :]                                        # (A,1,1,E)
    x = x_wrd[None]                                                    # (1,B,L,E)
    num = jnp.sum(a * x, axis=-1)
    den = (jnp.maximum(jnp.linalg.norm(a, axis=-1), 1e-8)
           * jnp.maximum(jnp.linalg.norm(x, axis=-1), 1e-8))
    sim = num / den                                                    # (A,B,L)
    sim = jnp.where(sim > word_thres, sim, 0.0)
    sim = sim * a_weight[:, None, None]
    centroid = jnp.max(jnp.where(sim > 0, sim, 0.0), axis=0)           # (B,L)
    centroid = jnp.sum(centroid, axis=1) / (inputs_len + 1e-5)         # (B,)
    sim_m = jnp.where(sim == 0.0, -1e9, sim)
    sim_max = jnp.max(sim_m, axis=0)                                   # (B,L)
    att = jax.nn.softmax(sim_max, axis=1)                              # (B,L)
    z = jnp.einsum("bl,ble->be", att, x_wrd)                           # (B,E)
    z = z * (centroid > 1e-4).astype(jnp.float32)[:, None]
    return z, att, centroid


if __name__ == "__main__":
    B, L = 2, 8
    vocab_size, emb_size, num_aspects = 50, 32, 4

    key = jax.random.PRNGKey(0)
    k_w, k_a, k_in = jax.random.split(key, 3)

    # deterministic parameter init (xavier-uniform style for word embeddings)
    bound = (6.0 / (vocab_size + emb_size)) ** 0.5
    w_emb = jax.random.uniform(k_w, (vocab_size, emb_size),
                               minval=-bound, maxval=bound, dtype=jnp.float32)
    a_emb = jax.random.normal(k_a, (num_aspects, emb_size), dtype=jnp.float32)
    a_weight = jnp.array([1.0, 0.8, 0.5, 1.2], dtype=jnp.float32)

    # token ids with some padding zeros
    inputs = jax.random.randint(k_in, (B, L), 0, vocab_size, dtype=jnp.int32)
    inputs = inputs.at[0, L - 2:].set(0)
    inputs = inputs.at[1, L - 1:].set(0)

    enc_out, enc_att, cscore = aspect_memory_summarizer(
        inputs, w_emb, a_emb, a_weight, word_thres=0.2)
    jax.block_until_ready((enc_out, enc_att, cscore))

    r_out, r_att, r_cs = _reference(inputs, w_emb, a_emb, a_weight, word_thres=0.2)
    # tolerance relaxed slightly vs f64 math because the softmax denominator
    # uses the EUP approximate reciprocal.
    assert jnp.allclose(enc_out, r_out, atol=2e-3, rtol=2e-3)
    assert jnp.allclose(enc_att, r_att, atol=2e-3, rtol=2e-3)
    assert jnp.allclose(cscore, r_cs, atol=2e-3, rtol=2e-3)

    print("KERNEL_OK")
</pallas_src>

<mosaic_0001>
module attributes {stable_mosaic.version = 11 : i64} {
  func.func @_summarizer_kernel(%arg0: i32, %arg1: memref<2x8x1xi32, #tpu.memory_space<vmem>>, %arg2: memref<2x1xf32, #tpu.memory_space<vmem>>, %arg3: memref<50x128xf32, #tpu.memory_space<vmem>>, %arg4: memref<128x4xf32, #tpu.memory_space<vmem>>, %arg5: memref<1x4xf32, #tpu.memory_space<vmem>>, %arg6: memref<2x128xf32, #tpu.memory_space<vmem>>, %arg7: memref<2x8xf32, #tpu.memory_space<vmem>>, %arg8: memref<2x1xf32, #tpu.memory_space<vmem>>) attributes {dimension_semantics = [#tpu.dimension_semantics<parallel>], iteration_bounds = array<i64: 1>, scalar_prefetch = 0 : i64, scratch_operands = 0 : i64, tpu.core_type = #tpu.core_type<tc>, window_params = [{transform_indices = @transform_0, window_bounds = array<i64: 2, 8, 1>}, {transform_indices = @transform_1, window_bounds = array<i64: 2, 1>}, {pipeline_mode = #tpu.pipeline_mode<synchronous>, transform_indices = @transform_2, window_bounds = array<i64: 50, 128>}, {pipeline_mode = #tpu.pipeline_mode<synchronous>, transform_indices = @transform_3, window_bounds = array<i64: 128, 4>}, {pipeline_mode = #tpu.pipeline_mode<synchronous>, transform_indices = @transform_4, window_bounds = array<i64: 1, 4>}, {transform_indices = @transform_5, window_bounds = array<i64: 2, 128>}, {transform_indices = @transform_6, window_bounds = array<i64: 2, 8>}, {transform_indices = @transform_7, window_bounds = array<i64: 2, 1>}]} {
    %c0 = arith.constant 0 : index
    %c0_0 = arith.constant 0 : index
    %c0_1 = arith.constant 0 : index
    %0 = vector.load %arg1[%c0, %c0_0, %c0_1] : memref<2x8x1xi32, #tpu.memory_space<vmem>>, vector<2x8x1xi32>
    %1 = tpu.iota {dimensions = array<i32: 2>} : vector<2x8x50xi32>
    %2 = vector.broadcast %0 : vector<2x8x1xi32> to vector<2x8x50xi32>
    %3 = arith.cmpi eq, %1, %2 : vector<2x8x50xi32>
    %4 = arith.extui %3 : vector<2x8x50xi1> to vector<2x8x50xi32>
    %5 = arith.sitofp %4 : vector<2x8x50xi32> to vector<2x8x50xf32>
    %6 = vector.shape_cast %5 : vector<2x8x50xf32> to vector<16x50xf32>
    %c0_2 = arith.constant 0 : index
    %c0_3 = arith.constant 0 : index
    %7 = vector.load %arg3[%c0_2, %c0_3] : memref<50x128xf32, #tpu.memory_space<vmem>>, vector<50x128xf32>
    %cst = arith.constant dense<0.000000e+00> : vector<16x128xf32>
    %8 = tpu.matmul %6, %7, %cst {dimension_numbers = #tpu.dot_dimension_numbers<[1], [0], [0], [1], [0, 0, 1, 1], [], []>} : vector<16x50xf32>, vector<50x128xf32>, vector<16x128xf32> -> vector<16x128xf32>
    %9 = vector.shape_cast %8 : vector<16x128xf32> to vector<2x8x128xf32>
    %c0_4 = arith.constant 0 : index
    %c0_5 = arith.constant 0 : index
    %10 = vector.load %arg4[%c0_4, %c0_5] : memref<128x4xf32, #tpu.memory_space<vmem>>, vector<128x4xf32>
    %cst_6 = arith.constant dense<0.000000e+00> : vector<16x4xf32>
    %11 = tpu.matmul %8, %10, %cst_6 {dimension_numbers = #tpu.dot_dimension_numbers<[1], [0], [0], [1], [0, 0, 1, 1], [], []>} : vector<16x128xf32>, vector<128x4xf32>, vector<16x4xf32> -> vector<16x4xf32>
    %12 = vector.shape_cast %11 : vector<16x4xf32> to vector<2x8x4xf32>
    %13 = arith.mulf %9, %9 : vector<2x8x128xf32>
    %cst_7 = arith.constant dense<0.000000e+00> : vector<2x8xf32>
    %14 = vector.multi_reduction <add>, %13, %cst_7 [2] : vector<2x8x128xf32> to vector<2x8xf32>
    %15 = vector.shape_cast %14 : vector<2x8xf32> to vector<2x8x1xf32>
    %cst_8 = arith.constant 1.000000e-16 : f32
    %16 = vector.broadcast %cst_8 : f32 to vector<2x8x1xf32>
    %17 = arith.maximumf %15, %16 : vector<2x8x1xf32>
    %18 = math.rsqrt %17 : vector<2x8x1xf32>
    %19 = vector.broadcast %18 : vector<2x8x1xf32> to vector<2x8x4xf32>
    %20 = arith.mulf %12, %19 : vector<2x8x4xf32>
    %cst_9 = arith.constant 2.000000e-01 : f32
    %21 = vector.broadcast %cst_9 : f32 to vector<2x8x4xf32>
    %22 = arith.cmpf ogt, %20, %21 : vector<2x8x4xf32>
    %c0_10 = arith.constant 0 : index
    %c0_11 = arith.constant 0 : index
    %23 = vector.load %arg5[%c0_10, %c0_11] : memref<1x4xf32, #tpu.memory_space<vmem>>, vector<1x4xf32>
    %24 = vector.shape_cast %23 : vector<1x4xf32> to vector<1x1x4xf32>
    %cst_12 = arith.constant 0.000000e+00 : f32
    %25 = vector.broadcast %cst_12 : f32 to vector<2x8x4xf32>
    %26 = arith.select %22, %20, %25 : vector<2x8x4xi1>, vector<2x8x4xf32>
    %27 = vector.broadcast %24 : vector<1x1x4xf32> to vector<2x8x4xf32>
    %28 = arith.mulf %26, %27 : vector<2x8x4xf32>
    %cst_13 = arith.constant 0.000000e+00 : f32
    %29 = vector.broadcast %cst_13 : f32 to vector<2x8x4xf32>
    %30 = arith.maximumf %28, %29 : vector<2x8x4xf32>
    %cst_14 = arith.constant dense<0xFF800000> : vector<2x8xf32>
    %31 = vector.multi_reduction <maximumf>, %30, %cst_14 [2] : vector<2x8x4xf32> to vector<2x8xf32>
    %32 = vector.shape_cast %31 : vector<2x8xf32> to vector<2x8x1xf32>
    %cst_15 = arith.constant dense<0.000000e+00> : vector<2x1xf32>
    %33 = vector.multi_reduction <add>, %32, %cst_15 [1] : vector<2x8x1xf32> to vector<2x1xf32>
    %c0_16 = arith.constant 0 : index
    %c0_17 = arith.constant 0 : index
    %34 = vector.load %arg2[%c0_16, %c0_17] : memref<2x1xf32, #tpu.memory_space<vmem>>, vector<2x1xf32>
    %35 = arith.mulf %33, %34 : vector<2x1xf32>
    %cst_18 = arith.constant 0.000000e+00 : f32
    %36 = vector.broadcast %cst_18 : f32 to vector<1x1x4xf32>
    %37 = arith.cmpf one, %24, %36 : vector<1x1x4xf32>
    %38 = vector.broadcast %37 : vector<1x1x4xi1> to vector<2x8x4xi1>
    %39 = arith.andi %22, %38 : vector<2x8x4xi1>
    %cst_19 = arith.constant -1.000000e+09 : f32
    %40 = vector.broadcast %cst_19 : f32 to vector<2x8x4xf32>
    %41 = arith.select %39, %28, %40 : vector<2x8x4xi1>, vector<2x8x4xf32>
    %cst_20 = arith.constant dense<0xFF800000> : vector<2x8xf32>
    %42 = vector.multi_reduction <maximumf>, %41, %cst_20 [2] : vector<2x8x4xf32> to vector<2x8xf32>
    %43 = vector.shape_cast %42 : vector<2x8xf32> to vector<2x8x1xf32>
    %cst_21 = arith.constant dense<0xFF800000> : vector<2x1xf32>
    %44 = vector.multi_reduction <maximumf>, %43, %cst_21 [1] : vector<2x8x1xf32> to vector<2x1xf32>
    %45 = vector.shape_cast %44 : vector<2x1xf32> to vector<2x1x1xf32>
    %46 = vector.broadcast %45 : vector<2x1x1xf32> to vector<2x8x1xf32>
    %47 = arith.subf %43, %46 : vector<2x8x1xf32>
    %48 = math.exp %47 : vector<2x8x1xf32>
    %cst_22 = arith.constant dense<0.000000e+00> : vector<2x1xf32>
    %49 = vector.multi_reduction <add>, %48, %cst_22 [1] : vector<2x8x1xf32> to vector<2x1xf32>
    %50 = vector.shape_cast %49 : vector<2x1xf32> to vector<2x1x1xf32>
    %51 = tpu.reciprocal %50 {approx = true} : vector<2x1x1xf32> -> vector<2x1x1xf32>
    %52 = vector.broadcast %51 : vector<2x1x1xf32> to vector<2x8x1xf32>
    %53 = arith.mulf %48, %52 : vector<2x8x1xf32>
    %54 = vector.broadcast %53 : vector<2x8x1xf32> to vector<2x8x128xf32>
    %55 = arith.mulf %54, %9 : vector<2x8x128xf32>
    %cst_23 = arith.constant dense<0.000000e+00> : vector<2x128xf32>
    %56 = vector.multi_reduction <add>, %55, %cst_23 [1] : vector<2x8x128xf32> to vector<2x128xf32>
    %cst_24 = arith.constant 9.99999974E-5 : f32
    %57 = vector.broadcast %cst_24 : f32 to vector<2x1xf32>
    %58 = arith.cmpf ogt, %35, %57 : vector<2x1xf32>
    %cst_25 = arith.constant 1.000000e+00 : f32
    %cst_26 = arith.constant 0.000000e+00 : f32
    %59 = vector.broadcast %cst_25 : f32 to vector<2x1xf32>
    %60 = vector.broadcast %cst_26 : f32 to vector<2x1xf32>
    %61 = arith.select %58, %59, %60 : vector<2x1xi1>, vector<2x1xf32>
    %62 = vector.broadcast %61 : vector<2x1xf32> to vector<2x128xf32>
    %63 = arith.mulf %56, %62 : vector<2x128xf32>
    %c0_27 = arith.constant 0 : index
    %c0_28 = arith.constant 0 : index
    %64 = vector.load %arg6[%c0_27, %c0_28] : memref<2x128xf32, #tpu.memory_space<vmem>>, vector<2x128xf32>
    tpu.vector_store %arg6[%c0_27, %c0_28], %63 {strides = array<i32>} : memref<2x128xf32, #tpu.memory_space<vmem>>, vector<2x128xf32>,
    %65 = vector.shape_cast %53 : vector<2x8x1xf32> to vector<2x8xf32>
    %c0_29 = arith.constant 0 : index
    %c0_30 = arith.constant 0 : index
    %66 = vector.load %arg7[%c0_29, %c0_30] : memref<2x8xf32, #tpu.memory_space<vmem>>, vector<2x8xf32>
    tpu.vector_store %arg7[%c0_29, %c0_30], %65 {strides = array<i32>} : memref<2x8xf32, #tpu.memory_space<vmem>>, vector<2x8xf32>,
    %c0_31 = arith.constant 0 : index
    %c0_32 = arith.constant 0 : index
    %67 = vector.load %arg8[%c0_31, %c0_32] : memref<2x1xf32, #tpu.memory_space<vmem>>, vector<2x1xf32>
    tpu.vector_store %arg8[%c0_31, %c0_32], %35 {strides = array<i32>} : memref<2x1xf32, #tpu.memory_space<vmem>>, vector<2x1xf32>,
    return
  }
  func.func @transform_0(%arg0: i32) -> (i32, i32, i32) {
    %c0_i32 = arith.constant 0 : i32
    %c0_i32_0 = arith.constant 0 : i32
    %c0_i32_1 = arith.constant 0 : i32
    return %arg0, %c0_i32, %c0_i32_0 : i32, i32, i32
  }
  func.func @transform_1(%arg0: i32) -> (i32, i32) {
    %c0_i32 = arith.constant 0 : i32
    %c0_i32_0 = arith.constant 0 : i32
    return %arg0, %c0_i32 : i32, i32
  }
  func.func @transform_2(%arg0: i32) -> (i32, i32) {
    %c0_i32 = arith.constant 0 : i32
    %c0_i32_0 = arith.constant 0 : i32
    %c0_i32_1 = arith.constant 0 : i32
    return %c0_i32, %c0_i32_0 : i32, i32
  }
  func.func @transform_3(%arg0: i32) -> (i32, i32) {
    %c0_i32 = arith.constant 0 : i32
    %c0_i32_0 = arith.constant 0 : i32
    %c0_i32_1 = arith.constant 0 : i32
    return %c0_i32, %c0_i32_0 : i32, i32
  }
  func.func @transform_4(%arg0: i32) -> (i32, i32) {
    %c0_i32 = arith.constant 0 : i32
    %c0_i32_0 = arith.constant 0 : i32
    %c0_i32_1 = arith.constant 0 : i32
    return %c0_i32, %c0_i32_0 : i32, i32
  }
  func.func @transform_5(%arg0: i32) -> (i32, i32) {
    %c0_i32 = arith.constant 0 : i32
    %c0_i32_0 = arith.constant 0 : i32
    return %arg0, %c0_i32 : i32, i32
  }
  func.func @transform_6(%arg0: i32) -> (i32, i32) {
    %c0_i32 = arith.constant 0 : i32
    %c0_i32_0 = arith.constant 0 : i32
    return %arg0, %c0_i32 : i32, i32
  }
  func.func @transform_7(%arg0: i32) -> (i32, i32) {
    %c0_i32 = arith.constant 0 : i32
    %c0_i32_0 = arith.constant 0 : i32
    return %arg0, %c0_i32 : i32, i32
  }
}

</mosaic_0001>

<bundles_post_ra>
// kernel: tpu_custom_call.1
= control target key start
LH: loop header
LB: loop body
LE: loop exit
PB: predicated region body
PF: predicated region fallthrough
CT: control target
= control target key end

     0   :  { %13 = vsyncpa [#allocation3], 0  ;;  %v613_v1 = vmov 0   ;;  %s796_s0 = inlined_call_operand.vmem [shape: s32[2,8,1], index: 0, kind: input, shape index: {}]   ;;  %s797_s1 = inlined_call_operand.vmem [shape: f32[2,1], index: 1, kind: input, shape index: {}]   ;;  %s798_s2 = inlined_call_operand.vmem [shape: f32[50,128], index: 2, kind: input, shape index: {}]   ;;  %s799_s3 = inlined_call_operand.vmem [shape: f32[128,4], index: 3, kind: input, shape index: {}]   ;;  %s800_s4 = inlined_call_operand.vmem [shape: f32[1,4], index: 4, kind: input, shape index: {}]   ;;  %s801_s5 = inlined_call_operand.hbm [shape: f32[2,128], index: 5, kind: output, shape index: {0}]   ;;  %s802_s6 = inlined_call_operand.hbm [shape: f32[2,8], index: 6, kind: output, shape index: {1}]   ;;  %s803_s7 = inlined_call_operand.vmem [shape: f32[2,1], index: 7, kind: output, shape index: {2}]  }
   0x1   :  { %v25_v0 = vld [vmem:[%s796_s0] sm:$0xff]  ;;  %551 = vset.pattern.permute.xlu0 %v613_v1  ;;  %v42_v3 = vld [vmem:[%s798_s2 + $0x8] sm:$0xff]  ;;  %v43_v4 = vld [vmem:[%s798_s2 + $0x10] sm:$0xff]  ;;  %552 = vset.pattern.permute.xlu1 %v613_v1 }
   0x2   :  { %v41_v2 = vld [vmem:[%s798_s2] sm:$0xff]  ;;  %30 = vperm.xlu0 %551, %v25_v0   ;;  %v26_v5 = vld [vmem:[%s796_s0 + $0x8] sm:$0xff]  ;;  %v44_v7 = vld [vmem:[%s798_s2 + $0x18] sm:$0xff] }
   0x3   :  { %v503_v6 = vpack.c.bf16 %v42_v3, %v41_v2  ;;  %v507_v8 = vpack.c.bf16 %v44_v7, %v43_v4  ;;  %v45_v9 = vld [vmem:[%s798_s2 + $0x20] sm:$0xff]  ;;  %v46_v10 = vld [vmem:[%s798_s2 + $0x28] sm:$0xff] }
   0x4   :  { %14 = vsyncpa [#allocation5], 0  ;;  %v511_v11 = vpack.c.bf16 %v46_v10, %v45_v9  ;;  %v134_v12 = vld [vmem:[%s799_s3] sm:$0xff]  ;;  %v135_v13 = vld [vmem:[%s799_s3 + $0x8] sm:$0xff]  ;;  %vm55_vm0 = vcmask 1041408   ;;  %v27_v37 = vlaneseq  ;;  %vm48_vm1 = vcmask 408576  }
   0x5   :  { %504 = vmatprep.subr.bf16.mxu0 %v503_v6  ;;  %v136_v14 = vld [vmem:[%s799_s3 + $0x10] sm:$0xff]  ;;  %v515_v15 = vpack.c.bf16 %v135_v13, %v134_v12  ;;  %v137_v16 = vld [vmem:[%s799_s3 + $0x18] sm:$0xff]  ;;  %v138_v18 = vld [vmem:[%s799_s3 + $0x20] sm:$0xff]  ;;  %v614_v40 = vmov 0.0   ;;  %vm252_vm10 = vcmask 31744   ;;  %vm362_vm11 = vcmask 1041409  }
   0x6   :  { %506 = vmatpush3.bf16.msra.mxu0 %v503_v6  ;;  %33 = vperm.xlu0 %551, %v26_v5   ;;  %v519_v17 = vpack.c.bf16 %v137_v16, %v136_v14  ;;  %v139_v19 = vld [vmem:[%s799_s3 + $0x28] sm:$0xff]  ;;  %v47_v20 = vld [vmem:[%s798_s2 + $0x30] sm:$0x3]  ;;  %v141_v23 = vld [vmem:[%s799_s3 + $0x38] sm:$0xff]  ;;  %v734_v38 = vand.u32 127, %v27_v37  ;;  %v753_v53 = vshrl.u32 %v27_v37, 7 }
   0x7   :  { %508 = vmatprep.subr.bf16.mxu0 %v507_v8  ;;  %516 = vmatprep.subr.bf16.mxu1 %v515_v15  ;;  %v523_v21 = vpack.c.bf16 %v139_v19, %v138_v18  ;;  %v140_v22 = vld [vmem:[%s799_s3 + $0x30] sm:$0xff]  ;;  %v142_v25 = vld [vmem:[%s799_s3 + $0x40] sm:$0xff]  ;;  %v143_v26 = vld [vmem:[%s799_s3 + $0x48] sm:$0xff]  ;;  %vm385_vm13 = vcmask 1024   ;;  %vm378_vm15 = vcmask 58368  }
   0x8   :  { %518 = vmatpush3.bf16.msra.mxu1 %v515_v15  ;;  %v527_v24 = vpack.c.bf16 %v141_v23, %v140_v22  ;;  %v531_v27 = vpack.c.bf16 %v143_v26, %v142_v25  ;;  %v144_v28 = vld [vmem:[%s799_s3 + $0x50] sm:$0xff]  ;;  %v145_v29 = vld [vmem:[%s799_s3 + $0x58] sm:$0xff]  ;;  %v146_v31 = vld [vmem:[%s799_s3 + $0x60] sm:$0xff]  ;;  %v245_v54 = vsub.s32 0, %v753_v53 }
   0x9   :  { %520 = vmatprep.subr.bf16.mxu1 %v519_v17  ;;  %v535_v30 = vpack.c.bf16 %v145_v29, %v144_v28  ;;  %v147_v32 = vld [vmem:[%s799_s3 + $0x68] sm:$0xff]  ;;  %v148_v34 = vld [vmem:[%s799_s3 + $0x70] sm:$0xff]  ;;  %v149_v35 = vld [vmem:[%s799_s3 + $0x78] sm:$0xff] }
   0xa   :  { %510 = vmatpush3.bf16.msra.mxu0 %v507_v8  ;;  %v539_v33 = vpack.c.bf16 %v147_v32, %v146_v31  ;;  %v543_v36 = vpack.c.bf16 %v149_v35, %v148_v34  ;;  %v239_v52 = vld [vmem:[%s800_s4] sm:$0x1] }
   0xb   :  { %512 = vmatprep.subr.bf16.mxu0 %v511_v11  ;;  %vm278_vm4 = vcmp.ne.f32.partialorder %v239_v52, 0.0  ;;  %v246_v61 = vrot.slane %v239_v52, %v245_v54  ;;  %v271_v22 = vld [vmem:[%s797_s1] sm:$0x3] }
   0xc   :  { %522 = vmatpush3.bf16.msra.mxu1 %v519_v17  ;;  %v279_v55 = vsel %vm278_vm4, 1, %v613_v1  ;;  %v273_v28 = vrot.slane %v271_v22, 1 }
   0xd   :  { %524 = vmatprep.subr.bf16.mxu1 %v523_v21  ;;  %v283_v56 = vrot.slane %v279_v55, %v245_v54 }
   0xe   :  { %514 = vmatpush3.bf16.msra.mxu0 %v511_v11 }
   0xf   :  { %463 = vmatprep.subr.msk.mxu0 %vm55_vm0, %v47_v20  ;;  %vm284_vm5 = vcmp.eq.s32.totalorder %v283_v56, 1 }
  0x10   :  { %526 = vmatpush3.bf16.msra.mxu1 %v523_v21 }
  0x11   :  { %528 = vmatprep.subr.bf16.mxu1 %v527_v24 }
  0x12   :  { %464 = vmatpush3.msk.msra.mxu0 %vm55_vm0, %v47_v20 }
  0x14   :  { %530 = vmatpush3.bf16.msra.mxu1 %v527_v24 }
  0x15   :  { %532 = vmatprep.subr.bf16.mxu1 %v531_v27 }
  0x18   :  { %534 = vmatpush3.bf16.msra.mxu1 %v531_v27 }
  0x19   :  { %536 = vmatprep.subr.bf16.mxu1 %v535_v30 }
  0x1c   :  { %538 = vmatpush3.bf16.msra.mxu1 %v535_v30 }
  0x1d   :  { %540 = vmatprep.subr.bf16.mxu1 %v539_v33 }
  0x20   :  { %542 = vmatpush3.bf16.msra.mxu1 %v539_v33 }
  0x21   :  { %544 = vmatprep.subr.bf16.mxu1 %v543_v36 }
  0x24   :  { %546 = vmatpush3.bf16.msra.mxu1 %v543_v36 }
  0x81   :  { %v31_v39 = vpop.permute.xlu0 %30 }
  0x82   :  { %vm35_vm2 = vcmp.eq.s32.totalorder %v734_v38, %v31_v39 }
  0x83   :  { %v419_v41 = vsel %vm35_vm2, 1.0, %v614_v40 }
  0x84   :  { %465 = vmatprep.mubr.msk.f32.mxu0 %vm48_vm1, %v419_v41 }
  0x85   :  { %v34_v42 = vpop.permute.xlu0 %33 }
  0x86   :  { %vm36_vm3 = vcmp.eq.s32.totalorder %v734_v38, %v34_v42 }
  0x87   :  { %v420_v43 = vsel %vm36_vm3, 1.0, %v614_v40 }
  0x88   :  { %466 = vmatmul.mubr.msk.f32.vlgmr.msra.gmra.mrb[0].mxu0 %vm48_vm1, %v420_v43 }
 0x15b   :  { %v740_v44 = vpop.f32.mrb[0].mxu0 }
 0x15c   :  { %v742_v45 = vpop.f32.mrb[1].mxu0  ;;  %v226_v46 = vmul.f32 %v740_v44, %v740_v44 }
 0x15d   :  { %500 = vmatprep.mubr.f32.mxu1 %v742_v45  ;;  %v225_v47 = vmul.f32 %v742_v45, %v742_v45 }
 0x15e   :  { %229 = vadd.xlane.f32.xlu1 %v226_v46  ;;  %501 = vmatmul.mubr.f32.vlgmr.msra.gmra.mrb[0].mxu1 %v740_v44 }
 0x162   :  { %227 = vadd.xlane.f32.xlu1 %v225_v47 }
 0x1eb   :  { %v230_v48 = vpop.xlane.xlu1 %229 }
 0x1ec   :  { %v232_v50 = vmax.f32 %v230_v48, 1e-16 }
 0x1ee   :  { %553 = vrsqrt.f32 %v232_v50 }
 0x1ef   :  { %v228_v49 = vpop.xlane.xlu1 %227 }
 0x1f0   :  { %v231_v51 = vmax.f32 %v228_v49, 1e-16 }
 0x1f2   :  { %555 = vrsqrt.f32 %v231_v51 }
 0x1f8   :  { %v554_v57 = vpop.eup %553 }
 0x1fc   :  { %v556_v59 = vpop.eup %555 }
 0x231   :  { %v502_v58 = vpop.f32.mrb[0].mxu1 }
 0x232   :  { %v236_v60 = vmul.f32 %v554_v57, %v502_v58  ;;  %v216_v62 = vpop.f32.mrb[1].mxu1 }
 0x233   :  { %v235_v63 = vmul.f32 %v556_v59, %v216_v62 }
 0x234   :  { %vm238_vm6 = vcmp.gt.f32.partialorder %v236_v60, 0.2 }
 0x235   :  { %v241_v0 = vsel %vm238_vm6, %v236_v60, 0.0  ;;  %vm237_vm7 = vcmp.gt.f32.partialorder %v235_v63, 0.2  ;;  %vm286_vm8 = vmand %vm238_vm6, %vm284_vm5 }
 0x236   :  { %v249_v2 = vmul.f32 %v246_v61, %v241_v0  ;;  %v240_v3 = vsel %vm237_vm7, %v235_v63, 0.0  ;;  %vm285_vm9 = vmand %vm237_vm7, %vm284_vm5 }
 0x237   :  { %v248_v4 = vmul.f32 %v246_v61, %v240_v3 }
 0x238   :  { %v251_v5 = vmax.f32 %v249_v2, 0.0  ;;  %v288_v1 = vsel %vm286_vm8, %v249_v2, -1e+09 }
 0x239   :  { %v250_v6 = vmax.f32 %v248_v4, 0.0  ;;  %v287_v7 = vsel %vm285_vm9, %v248_v4, -1e+09  ;;  %v292_v10 = vsel %vm252_vm10, %v288_v1, -inf }
 0x23a   :  { %v256_v8 = vsel %vm252_vm10, %v251_v5, -inf  ;;  %v289_v11 = vsel %vm252_vm10, %v287_v7, -inf }
 0x23b   :  { %257 = vmax.xlane.f32.xlu0 %v256_v8  ;;  %v253_v9 = vsel %vm252_vm10, %v250_v6, -inf }
 0x23c   :  { %254 = vmax.xlane.f32.xlu1 %v253_v9  ;;  %v370_v9 = vsub.s32 %v734_v38, %v753_v53 }
 0x240   :  { %293 = vmax.xlane.f32.xlu1 %v292_v10 }
 0x244   :  { %290 = vmax.xlane.f32.xlu1 %v289_v11 }
 0x2c8   :  { %v258_v12 = vpop.xlane.xlu0 %257 }
 0x2c9   :  { %v265_v13 = vrot.slane %v258_v12, 4  ;;  %v255_v14 = vpop.xlane.xlu1 %254 }
 0x2ca   :  { %v259_v15 = vrot.slane %v255_v14, 4 }
 0x2cb   :  { %v266_v16 = vadd.f32 %v265_v13, %v258_v12 }
 0x2cc   :  { %v260_v17 = vadd.f32 %v259_v15, %v255_v14 }
 0x2cd   :  { %v267_v18 = vrot.slane %v266_v16, 2  ;;  %v294_v19 = vpop.xlane.xlu1 %293 }
 0x2ce   :  { %v261_v20 = vrot.slane %v260_v17, 2  ;;  %v301_v21 = vrot.slane %v294_v19, 4 }
 0x2cf   :  { %v268_v23 = vadd.f32 %v267_v18, %v266_v16 }
 0x2d0   :  { %v262_v24 = vadd.f32 %v261_v20, %v260_v17  ;;  %v302_v25 = vmax.f32 %v294_v19, %v301_v21 }
 0x2d1   :  { %v269_v26 = vrot.slane %v268_v23, 1  ;;  %v291_v27 = vpop.xlane.xlu1 %290 }
 0x2d2   :  { %v263_v29 = vrot.slane %v262_v24, 1  ;;  %v303_v30 = vrot.slane %v302_v25, 2  ;;  %v295_v31 = vrot.slane %v291_v27, 4 }
 0x2d3   :  { %v270_v32 = vadd.f32 %v269_v26, %v268_v23 }
 0x2d4   :  { %v264_v33 = vadd.f32 %v263_v29, %v262_v24  ;;  %v304_v34 = vmax.f32 %v302_v25, %v303_v30  ;;  %v296_v35 = vmax.f32 %v291_v27, %v295_v31 }
 0x2d5   :  { %v277_v36 = vmul.f32 %v273_v28, %v270_v32 }
 0x2d6   :  { %v305_v37 = vrot.slane %v304_v34, 1  ;;  %v297_v39 = vrot.slane %v296_v35, 2  ;;  %v276_v41 = vmul.f32 %v271_v22, %v264_v33 }
 0x2d7   :  { %vm344_vm12 = vcmp.gt.f32.partialorder %v277_v36, 0.0001  ;;  %v382_v42 = vrot.slane %v277_v36, 7 }
 0x2d8   :  { %v306_v43 = vmax.f32 %v304_v34, %v305_v37  ;;  %v298_v46 = vmax.f32 %v296_v35, %v297_v39  ;;  %v346_v47 = vsel %vm344_vm12, 1.0, %v614_v40  ;;  %vm343_vm14 = vcmp.gt.f32.partialorder %v276_v41, 0.0001 }
 0x2d9   :  { %354 = vperm.xlu1 %552, %v346_v47   ;;  %v383_v48 = vsel %vm362_vm11, %v382_v42, %v276_v41  ;;  %v345_v54 = vsel %vm343_vm14, 1.0, %v614_v40 }
 0x2da   :  { %v308_v49 = vsub.f32 %v294_v19, %v306_v43  ;;  %v299_v50 = vrot.slane %v298_v46, 1  ;;  %386 = vst.msk [vmem:[%s803_s7] sm:$0x3] %vm385_vm13, %v383_v48  ;;  %s615_s7 = smov [#allocation4]  }
 0x2db   :  { %s403_s28 = sshll.u32 %s615_s7, 4  ;;  %s404_s28 = int_to_ptr.vmem [resolvable:$true] %s403_s28 }
 0x2dc   :  { %v311_v51 = vmul.f32 1.442695, %v308_v49  ;;  %v300_v52 = vmax.f32 %v298_v46, %v299_v50  ;;  %s565_s29 = scalar_lea.vmem %s404_s28, 32  ;;  %p570_p1 = scmp.lt.s32.totalorder %s404_s28, %s404_s28 }
 0x2dd   :  { %349 = vperm.xlu1 %552, %v345_v54   ;;  %p566_p0 = scmp.ne.s32.totalorder %s404_s28, %s565_s29  ;;  %p571_p2 = scmp.lt.s32.totalorder %s565_s29, %s565_s29 }
 0x2de   :  { %557 = vpow2.f32 %v311_v51  ;;  %v307_v55 = vsub.f32 %v291_v27, %v300_v52 }
 0x2df   :  { %p572_p3 = por %p571_p2, %p570_p1 }
 0x2e0   :  { %v309_v56 = vmul.f32 1.442695, %v307_v55 }
 0x2e1   :  { %p573_p4 = pnand %p572_p3, %p566_p0 }
 0x2e2   :  { %559 = vpow2.f32 %v309_v56 }
 0x2e8   :  { %v558_v57 = vpop.eup %557 }
 0x2e9   :  { %v319_v58 = vrot.slane %v558_v57, 4 }
 0x2eb   :  { %v320_v59 = vadd.f32 %v558_v57, %v319_v58 }
 0x2ec   :  { %v560_v60 = vpop.eup %559 }
 0x2ed   :  { %v321_v61 = vrot.slane %v320_v59, 2  ;;  %v313_v62 = vrot.slane %v560_v60, 4 }
 0x2ef   :  { %v322_v63 = vadd.f32 %v321_v61, %v320_v59  ;;  %v314_v0 = vadd.f32 %v560_v60, %v313_v62 }
 0x2f1   :  { %v323_v2 = vrot.slane %v322_v63, 1  ;;  %v315_v3 = vrot.slane %v314_v0, 2 }
 0x2f3   :  { %v324_v4 = vadd.f32 %v323_v2, %v322_v63  ;;  %v316_v5 = vadd.f32 %v315_v3, %v314_v0 }
 0x2f5   :  { %561 = vrcp.f32 %v324_v4  ;;  %v317_v1 = vrot.slane %v316_v5, 1 }
 0x2f7   :  { %v318_v40 = vadd.f32 %v317_v1, %v316_v5 }
 0x2f9   :  { %563 = vrcp.f32 %v318_v40 }
 0x2ff   :  { %v562_v6 = vpop.eup %561 }
 0x300   :  { %v328_v7 = vmul.f32 %v562_v6, %v558_v57 }
 0x302   :  { %v330_v8 = vmul.f32 %v740_v44, %v328_v7  ;;  %v375_v14 = vrot.slane %v328_v7, %v370_v9 }
 0x303   :  { %v564_v10 = vpop.eup %563 }
 0x304   :  { %v327_v11 = vmul.f32 %v564_v10, %v560_v60 }
 0x306   :  { %v329_v12 = vmul.f32 %v327_v11, %v742_v45  ;;  %v371_v13 = vrot.slane %v327_v11, %v370_v9 }
 0x308   :  { %v376_v15 = vsel %vm362_vm11, %v375_v14, %v371_v13 }
 0x309   :  { %379 = vst.msk [vmem:[#allocation4] sm:$0x3] %vm378_vm15, %v376_v15 }
 0x30a   :  { %576 = shalt.err (!%p573_p4)
}
 0x30b   :  { %s577_s9 = scalar_lea.hbm %s802_s6, 32 }
 0x30c   :  { %p578_p5 = scmp.ne.s32.totalorder %s802_s6, %s577_s9  ;;  %p581_p6 = scmp.lt.u32.totalorder %s577_s9, %s802_s6 }
 0x30e   :  { %p583_p7 = pnand %p581_p6, %p578_p5 }
 0x310   :  { %586 = shalt.err (!%p583_p7)
}
 0x311   :  { %406 = dma.vmem_to_hbm [thread:$0]  %s404_s28, 32, %s802_s6, [#allocation5]   ;;  %v337_v38 = vrot.slane %v330_v8, 4  ;;  %v331_v45 = vrot.slane %v329_v12, 4 }
 0x312   :  { %s616_s15 = smov [#allocation2]  }
 0x313   :  { %v338_v44 = vadd.f32 %v337_v38, %v330_v8  ;;  %v332_v16 = vadd.f32 %v331_v45, %v329_v12  ;;  %s393_s16 = sshll.u32 %s616_s15, 4  ;;  %s394_s16 = int_to_ptr.vmem [resolvable:$true] %s393_s16 }
 0x314   :  { %s587_s6 = scalar_lea.vmem %s394_s16, 32  ;;  %p592_p9 = scmp.lt.s32.totalorder %s394_s16, %s394_s16 }
 0x315   :  { %v339_v53 = vrot.slane %v338_v44, 2  ;;  %v333_v18 = vrot.slane %v332_v16, 2  ;;  %p588_p8 = scmp.ne.s32.totalorder %s394_s16, %s587_s6  ;;  %p593_p10 = scmp.lt.s32.totalorder %s587_s6, %s587_s6 }
 0x317   :  { %v340_v17 = vadd.f32 %v339_v53, %v338_v44  ;;  %v334_v20 = vadd.f32 %v333_v18, %v332_v16  ;;  %p594_p11 = por %p593_p10, %p592_p9 }
 0x319   :  { %v341_v19 = vrot.slane %v340_v17, 1  ;;  %v335_v22 = vrot.slane %v334_v20, 1  ;;  %p595_p12 = pnand %p594_p11, %p588_p8 }
 0x31b   :  { %v342_v21 = vadd.f32 %v341_v19, %v340_v17  ;;  %v336_v25 = vadd.f32 %v335_v22, %v334_v20 }
 0x358   :  { %v355_v23 = vpop.permute.xlu1 %354 }
 0x359   :  { %v358_v24 = vmul.f32 %v355_v23, %v342_v21 }
 0x35b   :  { %v361_v27 = vrot.slane %v358_v24, 7 }
 0x35c   :  { %v350_v26 = vpop.permute.xlu1 %349 }
 0x35d   :  { %v357_v28 = vmul.f32 %v350_v26, %v336_v25 }
 0x35f   :  { %v363_v29 = vsel %vm362_vm11, %v361_v27, %v357_v28 }
 0x360   :  { %365 = vst [vmem:[#allocation2] sm:$0x3] %v363_v29 }
 0x361   :  { %598 = shalt.err (!%p595_p12)
}
 0x362   :  { %s599_s18 = scalar_lea.hbm %s801_s5, 32 }
 0x363   :  { %p600_p13 = scmp.ne.s32.totalorder %s801_s5, %s599_s18  ;;  %p603_p0 = scmp.lt.u32.totalorder %s599_s18, %s801_s5 }
 0x365   :  { %p605_p1 = pnand %p603_p0, %p600_p13 }
 0x367   :  { %608 = shalt.err (!%p605_p1)
}
 0x368   :  { %396 = dma.vmem_to_hbm [thread:$0]  %s394_s16, 32, %s801_s5, [#allocation3]  }
 0x369   :  { %609 = dma.done.wait [#allocation3], 32  }
 0x36a   :  { %610 = vsyncadd [#allocation3], 4294967264 }
 0x36b   :  { %611 = dma.done.wait [#allocation5], 32  }
 0x36c   :  { %612 = vsyncadd [#allocation5], 4294967264 }
 0x36d   :  { %417 = vsyncpa [#allocation3], 1 }
 0x36e   :  { %418 = vsyncpa [#allocation5], 1 }

</bundles_post_ra>
